<compile_context>
chip_gen: v7x
topology: tpu7x:2x2x1
jax: 0.10.0
libtpu: 0.0.40
codegen_flags: <defaults>
</compile_context>

<pallas_src>
import jax
import jax.numpy as jnp
from jax.experimental import pallas as pl
from jax.experimental.pallas import tpu as pltpu

OBS_DIM = 3
ACT_DIM = 1
HIDDEN = 128
LANE = 128
_MAX_TILES_PER_BLOCK = 16          # tb cap = 16 * 128 = 2048 batch rows per grid step
_PALLAS_MIN_BATCH = 128            # below this, fall back to plain jnp


def _round_up(v, m):
    return ((v + m - 1) // m) * m


def _critic_kernel(xa_ref, w1_ref, w2_ref, b2_ref, o_ref):
    """One batch tile (feature-major): q1^T = W2 @ ReLU([W1^T|b1] @ [xa;1]) + b2."""
    # Layer 1 on the MXU: [128, 8] @ [8, tb] -> [128, tb]  (b1 folded via ones row).
    h = jnp.dot(w1_ref[...], xa_ref[...], preferred_element_type=jnp.float32)
    h = jnp.maximum(h, 0.0)                                   # ReLU, [HIDDEN, tb]
    # Layer 2 on the MXU: [1, 128] @ [128, tb] -> lane-dense [1, tb].
    q = jnp.dot(w2_ref[...], h, preferred_element_type=jnp.float32)
    o_ref[...] = q + b2_ref[0, 0]                             # b2 scalar splat from SMEM


def critic_forward_ref(x, a, params):
    """Plain-JAX reference (also the small-batch fallback path)."""
    w1, b1, w2, b2 = params
    xa = jnp.concatenate([x.astype(jnp.float32), a.astype(jnp.float32)], axis=-1)
    h = jnp.maximum(xa @ w1 + b1, 0.0)
    return h @ w2.reshape(HIDDEN, 1) + b2


def critic_forward(x, a, params, *, use_pallas=None):
    """Pallas equivalent of Critic.forward(x, a) -> q1.

    x: [B, 3] f32, a: [B, 1] f32 -> q1: [B, 1] f32.
    use_pallas: None = auto (Pallas only for B >= 128), True/False = force.
    """
    w1, b1, w2, b2 = params
    B = x.shape[0]

    if use_pallas is None:
        use_pallas = B >= _PALLAS_MIN_BATCH
    if not use_pallas:
        return critic_forward_ref(x, a, params)

    # --- batch tiling: pad to lane multiples, >=2 grid steps when possible ---
    b_pad = _round_up(B, LANE)
    n_tiles = b_pad // LANE
    if n_tiles > 1:
        n_blocks = max(2, pl.cdiv(n_tiles, _MAX_TILES_PER_BLOCK))
    else:
        n_blocks = 1
    tiles_per_block = pl.cdiv(n_tiles, n_blocks)
    tb = tiles_per_block * LANE
    b_pad = _round_up(b_pad, tb)
    grid = (b_pad // tb,)

    # --- pack inputs feature-major: [8, B_pad] (x^T, a^T, ones, zero pad) ---
    xf = x.astype(jnp.float32)
    af = a.astype(jnp.float32)
    xa_t = jnp.concatenate(
        [xf.T, af.T, jnp.ones((1, B), jnp.float32), jnp.zeros((3, B), jnp.float32)],
        axis=0)                                              # [8, B]
    xa_t = jnp.pad(xa_t, ((0, 0), (0, b_pad - B)))           # [8, B_pad]

    # --- pack weights: [W1^T | b1 | 0] as one [128, 8] block; w2 as a row ---
    wpack = jnp.concatenate(
        [w1.astype(jnp.float32).T,                           # [128, 4]
         b1.astype(jnp.float32).reshape(HIDDEN, 1),          # [128, 1]
         jnp.zeros((HIDDEN, 3), jnp.float32)],               # [128, 3]
        axis=1)                                              # [128, 8]
    w2row = w2.astype(jnp.float32).reshape(1, HIDDEN)        # [1, 128]
    b2s = jnp.reshape(b2, (1, 1)).astype(jnp.float32)        # (1, 1) -> SMEM

    out = pl.pallas_call(
        _critic_kernel,
        out_shape=jax.ShapeDtypeStruct((1, b_pad), jnp.float32),
        grid=grid,
        in_specs=[
            pl.BlockSpec((8, tb), lambda i: (0, i)),                 # packed xa^T tile
            pl.BlockSpec((HIDDEN, 8), lambda i: (0, 0)),             # [W1^T | b1]
            pl.BlockSpec((1, HIDDEN), lambda i: (0, 0)),             # w2 row
            pl.BlockSpec(memory_space=pltpu.MemorySpace.SMEM),       # b2 scalar
        ],
        out_specs=pl.BlockSpec((1, tb), lambda i: (0, i)),           # lane-dense q1^T
        compiler_params=pltpu.CompilerParams(
            dimension_semantics=("parallel",)),                      # v7x: both TCs split batch
    )(xa_t, wpack, w2row, b2s)

    return out[0, :B].reshape(B, 1)


def init_critic_params(key):
    """Deterministic init matching nn.Linear default (uniform +/- 1/sqrt(fan_in)).

    Returns math-layout params: w1 [4,128], b1 [128], w2 [128], b2 scalar.
    """
    k1, k2, k3, k4 = jax.random.split(key, 4)
    fan1 = OBS_DIM + ACT_DIM
    lim1 = 1.0 / jnp.sqrt(jnp.float32(fan1))
    lim2 = 1.0 / jnp.sqrt(jnp.float32(HIDDEN))
    w1 = jax.random.uniform(k1, (fan1, HIDDEN), jnp.float32, -lim1, lim1)
    b1 = jax.random.uniform(k2, (HIDDEN,), jnp.float32, -lim1, lim1)
    w2 = jax.random.uniform(k3, (HIDDEN,), jnp.float32, -lim2, lim2)
    b2 = jax.random.uniform(k4, (), jnp.float32, -lim2, lim2)
    return (w1, b1, w2, b2)


if __name__ == "__main__":
    key = jax.random.PRNGKey(0)
    kx, ka, kp = jax.random.split(key, 3)
    params = init_critic_params(kp)

    # Small batch, forced through the Pallas kernel (grid=1, padded to 128 lanes).
    B_small = 8
    x_s = jax.random.normal(kx, (B_small, OBS_DIM), jnp.float32)
    a_s = jax.random.normal(ka, (B_small, ACT_DIM), jnp.float32)
    q_small = critic_forward(x_s, a_s, params, use_pallas=True)
    jax.block_until_ready(q_small)
    ref_small = critic_forward_ref(x_s, a_s, params)
    assert q_small.shape == (B_small, 1)
    assert jnp.allclose(q_small, ref_small, atol=1e-4, rtol=1e-4), "mismatch (small B)"

    # Larger, non-multiple-of-128 batch: exercises padding + a 2-step parallel grid.
    B_big = 300
    kx2, ka2 = jax.random.split(kx)
    x_b = jax.random.normal(kx2, (B_big, OBS_DIM), jnp.float32)
    a_b = jax.random.normal(ka2, (B_big, ACT_DIM), jnp.float32)
    q_big = critic_forward(x_b, a_b, params)          # auto -> Pallas path (B >= 128)
    jax.block_until_ready(q_big)
    ref_big = critic_forward_ref(x_b, a_b, params)
    assert q_big.shape == (B_big, 1)
    assert jnp.allclose(q_big, ref_big, atol=1e-4, rtol=1e-4), "mismatch (big B)"

    # Tiny-batch auto path falls back to plain jnp (overhead gate).
    q_auto = critic_forward(x_s, a_s, params)
    jax.block_until_ready(q_auto)
    assert jnp.allclose(q_auto, ref_small, atol=1e-5), "mismatch (fallback)"

    print("KERNEL_OK")
</pallas_src>

<mosaic_0001>
module attributes {stable_mosaic.version = 11 : i64} {
  func.func @_critic_kernel(%arg0: i32, %arg1: memref<8x128xf32, #tpu.memory_space<vmem>>, %arg2: memref<128x8xf32, #tpu.memory_space<vmem>>, %arg3: memref<1x128xf32, #tpu.memory_space<vmem>>, %arg4: memref<1x1xf32, #tpu.memory_space<smem>>, %arg5: memref<1x128xf32, #tpu.memory_space<vmem>>) attributes {dimension_semantics = [#tpu.dimension_semantics<parallel>], iteration_bounds = array<i64: 1>, scalar_prefetch = 0 : i64, scratch_operands = 0 : i64, tpu.core_type = #tpu.core_type<tc>, window_params = [{transform_indices = @transform_0, window_bounds = array<i64: 8, 128>}, {pipeline_mode = #tpu.pipeline_mode<synchronous>, transform_indices = @transform_1, window_bounds = array<i64: 128, 8>}, {pipeline_mode = #tpu.pipeline_mode<synchronous>, transform_indices = @transform_2, window_bounds = array<i64: 1, 128>}, {transform_indices = @transform_3, window_bounds = array<i64: 1, 1>}, {transform_indices = @transform_4, window_bounds = array<i64: 1, 128>}]} {
    %c0 = arith.constant 0 : index
    %c0_0 = arith.constant 0 : index
    %0 = vector.load %arg2[%c0, %c0_0] : memref<128x8xf32, #tpu.memory_space<vmem>>, vector<128x8xf32>
    %c0_1 = arith.constant 0 : index
    %c0_2 = arith.constant 0 : index
    %1 = vector.load %arg1[%c0_1, %c0_2] : memref<8x128xf32, #tpu.memory_space<vmem>>, vector<8x128xf32>
    %cst = arith.constant dense<0.000000e+00> : vector<128x128xf32>
    %2 = tpu.matmul %0, %1, %cst {dimension_numbers = #tpu.dot_dimension_numbers<[1], [0], [0], [1], [0, 0, 1, 1], [], []>} : vector<128x8xf32>, vector<8x128xf32>, vector<128x128xf32> -> vector<128x128xf32>
    %cst_3 = arith.constant 0.000000e+00 : f32
    %3 = vector.broadcast %cst_3 : f32 to vector<128x128xf32>
    %4 = arith.maximumf %2, %3 : vector<128x128xf32>
    %c0_4 = arith.constant 0 : index
    %c0_5 = arith.constant 0 : index
    %5 = vector.load %arg3[%c0_4, %c0_5] : memref<1x128xf32, #tpu.memory_space<vmem>>, vector<1x128xf32>
    %cst_6 = arith.constant dense<0.000000e+00> : vector<1x128xf32>
    %6 = tpu.matmul %5, %4, %cst_6 {dimension_numbers = #tpu.dot_dimension_numbers<[1], [0], [0], [1], [0, 0, 1, 1], [], []>} : vector<1x128xf32>, vector<128x128xf32>, vector<1x128xf32> -> vector<1x128xf32>
    %c0_7 = arith.constant 0 : index
    %c0_8 = arith.constant 0 : index
    %7 = memref.load %arg4[%c0_7, %c0_8] : memref<1x1xf32, #tpu.memory_space<smem>>
    %8 = vector.broadcast %7 : f32 to vector<1x128xf32>
    %9 = arith.addf %6, %8 : vector<1x128xf32>
    %c0_9 = arith.constant 0 : index
    %c0_10 = arith.constant 0 : index
    %10 = vector.load %arg5[%c0_9, %c0_10] : memref<1x128xf32, #tpu.memory_space<vmem>>, vector<1x128xf32>
    tpu.vector_store %arg5[%c0_9, %c0_10], %9 {strides = array<i32>} : memref<1x128xf32, #tpu.memory_space<vmem>>, vector<1x128xf32>,
    return
  }
  func.func @transform_0(%arg0: i32) -> (i32, i32) {
    %c0_i32 = arith.constant 0 : i32
    %c0_i32_0 = arith.constant 0 : i32
    return %c0_i32, %arg0 : i32, i32
  }
  func.func @transform_1(%arg0: i32) -> (i32, i32) {
    %c0_i32 = arith.constant 0 : i32
    %c0_i32_0 = arith.constant 0 : i32
    %c0_i32_1 = arith.constant 0 : i32
    return %c0_i32, %c0_i32_0 : i32, i32
  }
  func.func @transform_2(%arg0: i32) -> (i32, i32) {
    %c0_i32 = arith.constant 0 : i32
    %c0_i32_0 = arith.constant 0 : i32
    %c0_i32_1 = arith.constant 0 : i32
    return %c0_i32, %c0_i32_0 : i32, i32
  }
  func.func @transform_3(%arg0: i32) -> (i32, i32) {
    %c0_i32 = arith.constant 0 : i32
    %c0_i32_0 = arith.constant 0 : i32
    %c0_i32_1 = arith.constant 0 : i32
    return %c0_i32, %c0_i32_0 : i32, i32
  }
  func.func @transform_4(%arg0: i32) -> (i32, i32) {
    %c0_i32 = arith.constant 0 : i32
    %c0_i32_0 = arith.constant 0 : i32
    return %c0_i32, %arg0 : i32, i32
  }
}

</mosaic_0001>

<bundles_post_ra>
// kernel: tpu_custom_call.1
= control target key start
LH: loop header
LB: loop body
LE: loop exit
PB: predicated region body
PF: predicated region fallthrough
CT: control target
= control target key end

     0   :  { %vm36_vm0 = vcmask 64512   ;;  %s611_s0 = inlined_call_operand.vmem [shape: f32[8,128], index: 0, kind: input, shape index: {}]   ;;  %s612_s1 = inlined_call_operand.vmem [shape: f32[128,8], index: 1, kind: input, shape index: {}]   ;;  %s613_s2 = inlined_call_operand.vmem [shape: f32[1,128], index: 2, kind: input, shape index: {}]   ;;  %s614_s3 = inlined_call_operand.<no memory space> [shape: f32[1,1], index: 3, kind: input, shape index: {}]   ;;  %s615_s4 = inlined_call_operand.hbm [shape: f32[1,128], index: 4, kind: output, shape index: {}]  }
   0x1   :  { %v35_v0 = vld [vmem:[%s611_s0] sm:$0xff]  ;;  %v20_v2 = vld [vmem:[%s612_s1 + $0x8] sm:$0xff]  ;;  %v21_v3 = vld [vmem:[%s612_s1 + $0x10] sm:$0xff] }
   0x2   :  { %v19_v1 = vld [vmem:[%s612_s1] sm:$0xff]  ;;  %384 = vmatprep.subr.mxu0 %v35_v0  ;;  %v22_v4 = vld [vmem:[%s612_s1 + $0x18] sm:$0xff] }
   0x3   :  { %386 = vmatprep.mubr.msk.f32.mxu0 %vm36_vm0, %v19_v1  ;;  %385 = vmatpush3.msra.mxu0 %v35_v0  ;;  %v23_v5 = vld [vmem:[%s612_s1 + $0x20] sm:$0xff] }
   0x4   :  { %387 = vmatmul.mubr.msk.f32.vlgmr.msra.gmra.mrb[0].mxu0 %vm36_vm0, %v20_v2 }
   0x5   :  { %389 = vmatprep.mubr.msk.f32.mxu0 %vm36_vm0, %v21_v3 }
   0x6   :  { %10 = vsyncpa [#allocation4], 0  ;;  %v24_v6 = vld [vmem:[%s612_s1 + $0x28] sm:$0xff]  ;;  %v25_v7 = vld [vmem:[%s612_s1 + $0x30] sm:$0xff]  ;;  %v497_v17 = vmov 0.0|0.0   ;;  %vm498_vm1 = vmmov 0   ;;  %v248_v60 = vstv %s614_s3 }
   0x7   :  { %v26_v8 = vld [vmem:[%s612_s1 + $0x38] sm:$0xff]  ;;  %v27_v9 = vld [vmem:[%s612_s1 + $0x40] sm:$0xff]  ;;  %v28_v10 = vld [vmem:[%s612_s1 + $0x48] sm:$0xff]  ;;  %445 = vmatprep.subr.bf16.mxu1 %v497_v17  ;;  %v499_v18 = vmov 0.0   ;;  %s500_s24 = smov [#allocation3]  }
   0x8   :  { %390 = vmatmul.mubr.msk.f32.gmra.mrb[2].mxu0 %vm36_vm0, %v22_v4  ;;  %v29_v11 = vld [vmem:[%s612_s1 + $0x50] sm:$0xff]  ;;  %v30_v12 = vld [vmem:[%s612_s1 + $0x58] sm:$0xff]  ;;  %v31_v13 = vld [vmem:[%s612_s1 + $0x60] sm:$0xff]  ;;  %442 = vmatprep.mubr.msk.f32.mxu1 %vm498_vm1, %v499_v18  ;;  %s326_s25 = sshll.u32 %s500_s24, 4  ;;  %s327_s25 = int_to_ptr.vmem [resolvable:$true] %s326_s25 }
   0x9   :  { %392 = vmatprep.mubr.msk.f32.mxu0 %vm36_vm0, %v23_v5  ;;  %v32_v14 = vld [vmem:[%s612_s1 + $0x68] sm:$0xff]  ;;  %v33_v15 = vld [vmem:[%s612_s1 + $0x70] sm:$0xff]  ;;  %v34_v16 = vld [vmem:[%s612_s1 + $0x78] sm:$0xff]  ;;  %s473_s26 = scalar_lea.vmem %s327_s25, 16  ;;  %s477_s27 = scalar_lea.vmem %s327_s25, 32 }
   0xa   :  { %v246_v59 = vld [vmem:[%s613_s2] sm:$0x1]  ;;  %p474_p0 = scmp.ne.s32.totalorder %s327_s25, %s473_s26  ;;  %p478_p1 = scmp.lt.s32.totalorder %s327_s25, %s327_s25 }
   0xb   :  { %p479_p2 = scmp.lt.s32.totalorder %s477_s27, %s473_s26 }
   0xc   :  { %393 = vmatmul.mubr.msk.f32.gmra.mrb[4].mxu0 %vm36_vm0, %v24_v6 }
   0xd   :  { %395 = vmatprep.mubr.msk.f32.mxu0 %vm36_vm0, %v25_v7  ;;  %p480_p3 = por %p479_p2, %p478_p1 }
   0xf   :  { %p481_p4 = pnand %p480_p3, %p474_p0 }
  0x10   :  { %396 = vmatmul.mubr.msk.f32.gmra.mrb[6].mxu0 %vm36_vm0, %v26_v8 }
  0x11   :  { %398 = vmatprep.mubr.msk.f32.mxu0 %vm36_vm0, %v27_v9 }
  0x14   :  { %399 = vmatmul.mubr.msk.f32.gmra.mrb[8].mxu0 %vm36_vm0, %v28_v10 }
  0x15   :  { %401 = vmatprep.mubr.msk.f32.mxu0 %vm36_vm0, %v29_v11 }
  0x18   :  { %402 = vmatmul.mubr.msk.f32.gmra.mrb[10].mxu0 %vm36_vm0, %v30_v12 }
  0x19   :  { %404 = vmatprep.mubr.msk.f32.mxu0 %vm36_vm0, %v31_v13 }
  0x1c   :  { %405 = vmatmul.mubr.msk.f32.gmra.mrb[12].mxu0 %vm36_vm0, %v32_v14 }
  0x1d   :  { %407 = vmatprep.mubr.msk.f32.mxu0 %vm36_vm0, %v33_v15 }
  0x20   :  { %408 = vmatmul.mubr.msk.f32.gmra.mrb[14].mxu0 %vm36_vm0, %v34_v16 }
  0xd7   :  { %v388_v19 = vpop.f32.mrb[0].mxu0 }
  0xd8   :  { %v231_v20 = vmax.f32 %v388_v19, 0.0  ;;  %v151_v21 = vpop.f32.mrb[1].mxu0 }
  0xd9   :  { %v230_v22 = vmax.f32 %v151_v21, 0.0 }
  0xdb   :  { %v391_v23 = vpop.f32.mrb[2].mxu0  ;;  %v446_v24 = vpack.c.bf16 %v231_v20, %v230_v22 }
  0xdc   :  { %v233_v25 = vmax.f32 %v391_v23, 0.0  ;;  %v161_v26 = vpop.f32.mrb[3].mxu0 }
  0xdd   :  { %v232_v27 = vmax.f32 %v161_v26, 0.0  ;;  %447 = vmatpush3.bf16.msra.mxu1 %v446_v24 }
  0xde   :  { %448 = vmatprep.subr.bf16.mxu1 %v497_v17 }
  0xdf   :  { %v449_v28 = vpack.c.bf16 %v233_v25, %v232_v27  ;;  %v394_v29 = vpop.f32.mrb[4].mxu0 }
  0xe0   :  { %v235_v30 = vmax.f32 %v394_v29, 0.0  ;;  %v171_v31 = vpop.f32.mrb[5].mxu0 }
  0xe1   :  { %v234_v32 = vmax.f32 %v171_v31, 0.0  ;;  %450 = vmatpush3.bf16.msra.mxu1 %v449_v28 }
  0xe2   :  { %451 = vmatprep.subr.bf16.mxu1 %v497_v17 }
  0xe3   :  { %v452_v33 = vpack.c.bf16 %v235_v30, %v234_v32  ;;  %v397_v34 = vpop.f32.mrb[6].mxu0 }
  0xe4   :  { %v237_v35 = vmax.f32 %v397_v34, 0.0  ;;  %v181_v36 = vpop.f32.mrb[7].mxu0 }
  0xe5   :  { %v236_v37 = vmax.f32 %v181_v36, 0.0  ;;  %453 = vmatpush3.bf16.msra.mxu1 %v452_v33 }
  0xe6   :  { %454 = vmatprep.subr.bf16.mxu1 %v497_v17 }
  0xe7   :  { %v455_v38 = vpack.c.bf16 %v237_v35, %v236_v37  ;;  %v400_v39 = vpop.f32.mrb[8].mxu0 }
  0xe8   :  { %v239_v40 = vmax.f32 %v400_v39, 0.0  ;;  %v191_v41 = vpop.f32.mrb[9].mxu0 }
  0xe9   :  { %v238_v42 = vmax.f32 %v191_v41, 0.0  ;;  %456 = vmatpush3.bf16.msra.mxu1 %v455_v38 }
  0xea   :  { %457 = vmatprep.subr.bf16.mxu1 %v497_v17 }
  0xeb   :  { %v458_v43 = vpack.c.bf16 %v239_v40, %v238_v42  ;;  %v403_v44 = vpop.f32.mrb[10].mxu0 }
  0xec   :  { %v241_v45 = vmax.f32 %v403_v44, 0.0  ;;  %v201_v46 = vpop.f32.mrb[11].mxu0 }
  0xed   :  { %v240_v47 = vmax.f32 %v201_v46, 0.0  ;;  %459 = vmatpush3.bf16.msra.mxu1 %v458_v43 }
  0xee   :  { %460 = vmatprep.subr.bf16.mxu1 %v497_v17 }
  0xef   :  { %v461_v48 = vpack.c.bf16 %v241_v45, %v240_v47  ;;  %v406_v49 = vpop.f32.mrb[12].mxu0 }
  0xf0   :  { %v243_v50 = vmax.f32 %v406_v49, 0.0  ;;  %v211_v51 = vpop.f32.mrb[13].mxu0 }
  0xf1   :  { %v242_v52 = vmax.f32 %v211_v51, 0.0  ;;  %462 = vmatpush3.bf16.msra.mxu1 %v461_v48 }
  0xf2   :  { %463 = vmatprep.subr.bf16.mxu1 %v497_v17 }
  0xf3   :  { %v464_v53 = vpack.c.bf16 %v243_v50, %v242_v52  ;;  %v409_v54 = vpop.f32.mrb[14].mxu0 }
  0xf4   :  { %v245_v55 = vmax.f32 %v409_v54, 0.0  ;;  %v221_v56 = vpop.f32.mrb[15].mxu0 }
  0xf5   :  { %v244_v57 = vmax.f32 %v221_v56, 0.0  ;;  %465 = vmatpush3.bf16.msra.mxu1 %v464_v53 }
  0xf6   :  { %466 = vmatprep.subr.bf16.mxu1 %v497_v17 }
  0xf7   :  { %v467_v58 = vpack.c.bf16 %v245_v55, %v244_v57 }
  0xf9   :  { %468 = vmatpush3.bf16.msra.mxu1 %v467_v58 }
  0xfc   :  { %443 = vmatmul.mubr.f32.vlgmr.msra.gmra.mrb[0].mxu1 %v246_v59 }
 0x1cf   :  { %v315_v61 = vpop.f32.mrb[0].mxu1 }
 0x1d0   :  { %v316_v62 = vadd.f32 %v315_v61, %v248_v60  ;;  %v444_v63 = vpop.f32.mrb[1].mxu1 }
 0x1d2   :  { %319 = vst [vmem:[#allocation3] sm:$0x1] %v316_v62 }
 0x1d3   :  { %484 = shalt.err (!%p481_p4)
}
 0x1d4   :  { %s485_s29 = scalar_lea.hbm %s615_s4, 16 }
 0x1d5   :  { %p486_p5 = scmp.ne.s32.totalorder %s615_s4, %s485_s29  ;;  %p489_p6 = scmp.lt.u32.totalorder %s485_s29, %s615_s4 }
 0x1d7   :  { %p491_p7 = pnand %p489_p6, %p486_p5 }
 0x1d9   :  { %494 = shalt.err (!%p491_p7)
}
 0x1da   :  { %329 = dma.vmem_to_hbm [thread:$0]  %s327_s25, 16, %s615_s4, [#allocation4]  }
 0x1db   :  { %495 = dma.done.wait [#allocation4], 16  }
 0x1dc   :  { %496 = vsyncadd [#allocation4], 4294967280 }
 0x1dd   :  { %333 = vsyncpa [#allocation4], 1 }

</bundles_post_ra>
